<compile_context>
chip_gen: v6e
topology: v6e:2x2x1
jax: 0.10.0
libtpu: 0.0.40
codegen_flags: <defaults>
</compile_context>

<pallas_src>
import math

import jax
import jax.numpy as jnp
from jax.experimental import pallas as pl
from jax.experimental.pallas import tpu as pltpu

D_FEAT = 32          # feature dim consumed by SelfAttention / heads
PATCH = 4            # patch size for the simplified swin encoder
GCN_IN = 8           # gcn_encoder(in_channels=8)
GCN_HID = 16         # gcn_encoder(hidden_channels=16)
SLAB_COLS = 128      # lane width of the packed constant slab / output slab


def _round_up(x, m):
    return (x + m - 1) // m * m


# --------------------------------------------------------------------------
# One-time host-side preparation (hoisted out of the per-forward path)
# --------------------------------------------------------------------------

def build_norm_adj(edge_index, num_nodes):
    # GCN-style symmetric normalization:  D^{-1/2} (A + I) D^{-1/2}
    src, dst = edge_index[0], edge_index[1]
    a = jnp.zeros((num_nodes, num_nodes), jnp.float32).at[src, dst].set(1.0)
    a = a + jnp.eye(num_nodes, dtype=jnp.float32)
    deg = jnp.sum(a, axis=1)
    d_inv_sqrt = 1.0 / jnp.sqrt(deg)
    return a * d_inv_sqrt[:, None] * d_inv_sqrt[None, :]


def prepare_fused_params(params, a_hat, batch, num_patches, num_nodes, patch_in_dim):
    """Pack every constant into one lane-dense (rows, 128) VMEM slab."""
    f32 = jnp.float32
    B, P, N, Cp, D = batch, num_patches, num_nodes, patch_in_dim, D_FEAT

    # --- attention: fold 1/sqrt(D) into Wq, concat QKV -> one (D, 3D) weight
    w_qkv = jnp.concatenate(
        [params["w_q"] * (1.0 / math.sqrt(D)), params["w_k"], params["w_v"]], axis=1)

    # --- heads: the whole chain is linear -> collapse to one (D, 4) weight.
    #   hc1 = [hazard1 | category1];  sq = [hazard_sq | category_sq]
    #   head = [hazard2 | category2] with output_range/output_shift folded in.
    w_hc1 = jnp.concatenate([params["w_h1"], params["w_c1"]], axis=1)        # (D, 6)
    b_hc1 = jnp.concatenate([params["b_h1"], params["b_c1"]], axis=1)        # (1, 6)
    w_sq, z31 = params["w_sq"], jnp.zeros((3, 1), f32)
    w_sq2 = jnp.concatenate([jnp.concatenate([w_sq, z31], axis=1),
                             jnp.concatenate([z31, w_sq], axis=1)], axis=0)  # (6, 2)
    b_sq2 = jnp.concatenate([params["b_sq"], params["b_sq"]], axis=1)        # (1, 2)
    out_range, out_shift = 6.0, -3.0
    w_h2, b_h2 = params["w_h2"], params["b_h2"]                              # (4,1),(1,1)
    w_c2, b_c2 = params["w_c2"], params["b_c2"]                              # (4,3),(1,3)
    w_fhc = jnp.zeros((6, 4), f32)
    w_fhc = w_fhc.at[0:3, 0:1].set(out_range * w_h2[0:3, :])    # hazard1 -> hazard2
    w_fhc = w_fhc.at[3:6, 1:4].set(w_c2[1:4, :])                # category1 -> category2
    w_fsq = jnp.zeros((2, 4), f32)
    w_fsq = w_fsq.at[1:2, 0:1].set(out_range * w_h2[3:4, :])    # cat_squeeze -> hazard2
    w_fsq = w_fsq.at[0:1, 1:4].set(w_c2[0:1, :])                # haz_squeeze -> category2
    b_fin = jnp.concatenate([out_range * b_h2 + out_shift, b_c2], axis=1)    # (1, 4)
    w_mid = w_fhc + w_sq2 @ w_fsq                                            # (6, 4)
    w_head = w_hc1 @ w_mid                                                   # (D, 4)
    b_head = b_hc1 @ w_mid + b_sq2 @ w_fsq + b_fin                           # (1, 4)

    # --- pooling matrices + block-diagonal normalized adjacency
    pool_p = jnp.kron(jnp.eye(B, dtype=f32), jnp.full((1, P), 1.0 / P, f32))  # (B, B*P)
    pool_n = jnp.kron(jnp.eye(B, dtype=f32), jnp.full((1, N), 1.0 / N, f32))  # (B, B*N)
    a_blk = jnp.kron(jnp.eye(B, dtype=f32), a_hat)                            # (B*N, B*N)

    bias_block = jnp.concatenate([
        jnp.pad(params["b_patch"], ((0, 0), (0, SLAB_COLS - D))),
        jnp.pad(params["b_g1"], ((0, 0), (0, SLAB_COLS - GCN_HID))),
        jnp.pad(params["b_g2"], ((0, 0), (0, SLAB_COLS - D))),
        jnp.pad(b_head, ((0, 0), (0, SLAB_COLS - 4))),
    ], axis=0)                                                                # (4, 128)

    pieces = [
        ("w_patch", params["w_patch"]),                        # (Cp, D)
        ("w_g1", params["w_g1"]),                              # (8, 16)
        ("w_g2", params["w_g2"]),                              # (16, 32)
        ("w_qkv", w_qkv),                                      # (D, 3D)
        ("w_head", w_head),                                    # (D, 4)
        ("a_blk", a_blk),                                      # (B*N, B*N)
        ("pool", jnp.concatenate([pool_p, pool_n], axis=1)),   # (B, B*(P+N))
        ("bias", bias_block),                                  # (4, 128)
    ]
    layout, padded, r = {}, [], 0
    for name, arr in pieces:
        nrow, ncol = arr.shape
        layout[name] = r                                       # 8-aligned row offset
        nrow_pad = _round_up(nrow, 8)
        padded.append(jnp.pad(arr.astype(f32),
                              ((0, nrow_pad - nrow), (0, SLAB_COLS - ncol))))
        r += nrow_pad
    w_slab = jnp.concatenate(padded, axis=0)                   # (168, 128) at defaults
    return w_slab, layout


# --------------------------------------------------------------------------
# Fused kernel + forward factory (static layout / dims closed over)
# --------------------------------------------------------------------------

def build_fused_forward(layout, B, C, H, W, N):
    ph, pw = H // PATCH, W // PATCH
    P, Cp, D = ph * pw, C * PATCH * PATCH, D_FEAT
    out_rows = max(8, _round_up(3 * B, 8))
    r_wp, r_g1, r_g2 = layout["w_patch"], layout["w_g1"], layout["w_g2"]
    r_qkv, r_hd = layout["w_qkv"], layout["w_head"]
    r_a, r_pool, r_b = layout["a_blk"], layout["pool"], layout["bias"]

    def kernel(xp_ref, xn_ref, w_ref, out_ref):
        f32 = jnp.float32

        # ---- swin-like patch encoder (whole batch, one matmul) -----------
        h = jnp.dot(xp_ref[...], w_ref[r_wp:r_wp + Cp, 0:D],
                    preferred_element_type=f32)
        h = jnp.maximum(h + w_ref[r_b:r_b + 1, 0:D], 0.0)              # (B*P, D)
        img = jnp.dot(w_ref[r_pool:r_pool + B, 0:B * P], h,
                      preferred_element_type=f32)                       # (B, D)

        # ---- 2-layer GCN, batch folded via block-diag adjacency ----------
        a = w_ref[r_a:r_a + B * N, 0:B * N]                             # (B*N, B*N)
        g = jnp.dot(xn_ref[...], w_ref[r_g1:r_g1 + GCN_IN, 0:GCN_HID],
                    preferred_element_type=f32)                         # A @ (x @ W1)
        g = jnp.maximum(jnp.dot(a, g, preferred_element_type=f32)
                        + w_ref[r_b + 1:r_b + 2, 0:GCN_HID], 0.0)
        g = jnp.dot(g, w_ref[r_g2:r_g2 + GCN_HID, 0:D],
                    preferred_element_type=f32)                         # A @ (g @ W2)
        g = jnp.maximum(jnp.dot(a, g, preferred_element_type=f32)
                        + w_ref[r_b + 2:r_b + 3, 0:D], 0.0)
        mrna = jnp.dot(w_ref[r_pool:r_pool + B, B * P:B * P + B * N], g,
                       preferred_element_type=f32)                      # (B, D)

        # ---- single-head attention over [img, mrna], tokens stacked ------
        # 1/sqrt(D) scale already folded into the Q block of w_qkv.
        t = jnp.concatenate([img, mrna], axis=0)                        # (2B, D)
        qkv = jnp.dot(t, w_ref[r_qkv:r_qkv + D, 0:3 * D],
                      preferred_element_type=f32)                       # (2B, 3D)
        q_i, q_m = qkv[0:B, 0:D], qkv[B:2 * B, 0:D]
        k_i, k_m = qkv[0:B, D:2 * D], qkv[B:2 * B, D:2 * D]
        v_i, v_m = qkv[0:B, 2 * D:3 * D], qkv[B:2 * B, 2 * D:3 * D]

        s_ii = jnp.sum(q_i * k_i, axis=-1, keepdims=True)               # (B, 1)
        s_im = jnp.sum(q_i * k_m, axis=-1, keepdims=True)
        s_mi = jnp.sum(q_m * k_i, axis=-1, keepdims=True)
        s_mm = jnp.sum(q_m * k_m, axis=-1, keepdims=True)

        m1 = jnp.maximum(s_ii, s_im)
        e_ii, e_im = jnp.exp(s_ii - m1), jnp.exp(s_im - m1)
        att_i = (e_ii * v_i + e_im * v_m) * pl.reciprocal(e_ii + e_im, approx=True)
        m2 = jnp.maximum(s_mi, s_mm)
        e_mi, e_mm = jnp.exp(s_mi - m2), jnp.exp(s_mm - m2)
        att_m = (e_mi * v_i + e_mm * v_m) * pl.reciprocal(e_mi + e_mm, approx=True)
        enh = 0.5 * (att_i + att_m)                                     # (B, D)

        # ---- collapsed linear head: one matmul, [hazard2 | category2] ----
        head = (jnp.dot(enh, w_ref[r_hd:r_hd + D, :],
                        preferred_element_type=f32)
                + w_ref[r_b + 3:r_b + 4, :])                            # (B, 128)

        # ---- single lane-dense (out_rows, 128) store ----------------------
        lane_pad = jnp.zeros((B, SLAB_COLS - D), f32)
        parts = [jnp.concatenate([img, lane_pad], axis=1),
                 jnp.concatenate([enh, lane_pad], axis=1),
                 head]
        if out_rows > 3 * B:
            parts.append(jnp.zeros((out_rows - 3 * B, SLAB_COLS), f32))
        out_ref[...] = jnp.concatenate(parts, axis=0)

    vmem = pl.BlockSpec(memory_space=pltpu.MemorySpace.VMEM)
    call = pl.pallas_call(
        kernel,
        out_shape=jax.ShapeDtypeStruct((out_rows, SLAB_COLS), jnp.float32),
        in_specs=[vmem, vmem, vmem],
        out_specs=vmem,
    )

    # TODO(synk): at larger batch (B >= ~16) on v7x, add a ("parallel",) batch
    # grid axis to shard across the 2 TensorCores; at B=2 grid-less is right.
    @jax.jit
    def forward(w_slab, wsi_img, mrna_data):
        # NCHW -> (B*P, Cp) patch-major; no lane padding (full-array dims OK).
        x = wsi_img.reshape(B, C, ph, PATCH, pw, PATCH)
        xp = jnp.transpose(x, (0, 2, 4, 1, 3, 5)).reshape(B * P, Cp)
        xn = mrna_data.reshape(B * N, GCN_IN)
        out = call(xp, xn, w_slab)
        img_features = out[0:B, 0:D]
        enhanced = out[B:2 * B, 0:D]
        hazard2 = out[2 * B:3 * B, 0:1]
        category2 = out[2 * B:3 * B, 1:4]
        return img_features, enhanced, hazard2, category2

    return forward


# --------------------------------------------------------------------------
# Deterministic parameter init (PyTorch-Linear-style uniform bounds)
# --------------------------------------------------------------------------

def _init_linear(key, fan_in, fan_out):
    kw, kb = jax.random.split(key)
    bound = 1.0 / math.sqrt(fan_in)
    w = jax.random.uniform(kw, (fan_in, fan_out), jnp.float32, -bound, bound)
    b = jax.random.uniform(kb, (1, fan_out), jnp.float32, -bound, bound)
    return w, b


def init_params(key, patch_in_dim):
    keys = jax.random.split(key, 12)
    params = {}
    params["w_patch"], params["b_patch"] = _init_linear(keys[0], patch_in_dim, D_FEAT)
    params["w_g1"], params["b_g1"] = _init_linear(keys[1], GCN_IN, GCN_HID)
    params["w_g2"], params["b_g2"] = _init_linear(keys[2], GCN_HID, D_FEAT)
    params["w_q"], _ = _init_linear(keys[3], D_FEAT, D_FEAT)
    params["w_k"], _ = _init_linear(keys[4], D_FEAT, D_FEAT)
    params["w_v"], _ = _init_linear(keys[5], D_FEAT, D_FEAT)
    params["w_h1"], params["b_h1"] = _init_linear(keys[6], D_FEAT, 3)   # Linear(32, 3)
    params["w_c1"], params["b_c1"] = _init_linear(keys[7], D_FEAT, 3)   # Linear(32, 3)
    params["w_sq"], params["b_sq"] = _init_linear(keys[8], 3, 1)        # Linear(3, 1)
    params["w_h2"], params["b_h2"] = _init_linear(keys[9], 4, 1)        # Linear(4, 1)
    params["w_c2"], params["b_c2"] = _init_linear(keys[10], 4, 3)       # Linear(4, 3)
    return params


# --------------------------------------------------------------------------
# Main
# --------------------------------------------------------------------------

if __name__ == "__main__":
    B, C, H, W = 2, 3, 16, 16         # wsi_img, NCHW
    N = 8                             # mrna graph nodes per sample

    key = jax.random.PRNGKey(0)
    k_par, k_img, k_mrna = jax.random.split(key, 3)

    params = init_params(k_par, C * PATCH * PATCH)
    wsi_img = jax.random.normal(k_img, (B, C, H, W), jnp.float32)
    mrna_data = jax.random.normal(k_mrna, (B, N, GCN_IN), jnp.float32)

    # deterministic bidirectional ring graph over the N mrna nodes
    src = jnp.arange(N, dtype=jnp.int32)
    dst = (src + 1) % N
    edge_index = jnp.stack([jnp.concatenate([src, dst]),
                            jnp.concatenate([dst, src])], axis=0)   # (2, 16)

    # Hoisted out of the per-forward path: adjacency, weight recombination,
    # head-chain collapse, QKV fusion, slab packing.
    a_hat = build_norm_adj(edge_index, N)
    P = (H // PATCH) * (W // PATCH)
    w_slab, layout = prepare_fused_params(params, a_hat, B, P, N, C * PATCH * PATCH)

    fwd = build_fused_forward(layout, B, C, H, W, N)
    img_features, enhanced, hazard2, category2 = fwd(w_slab, wsi_img, mrna_data)
    jax.block_until_ready((img_features, enhanced, hazard2, category2))

    assert img_features.shape == (B, D_FEAT)
    assert enhanced.shape == (B, D_FEAT)
    assert hazard2.shape == (B, 1)
    assert category2.shape == (B, 3)
    print("KERNEL_OK")
</pallas_src>

<mosaic_0001>
module attributes {stable_mosaic.version = 11 : i64} {
  func.func @kernel(%arg0: memref<32x48xf32, #tpu.memory_space<vmem>>, %arg1: memref<16x8xf32, #tpu.memory_space<vmem>>, %arg2: memref<168x128xf32, #tpu.memory_space<vmem>>, %arg3: memref<8x128xf32, #tpu.memory_space<vmem>>) attributes {dimension_semantics = [], scalar_prefetch = 0 : i64, scratch_operands = 0 : i64, tpu.core_type = #tpu.core_type<tc>} {
    %c0 = arith.constant 0 : index
    %c0_0 = arith.constant 0 : index
    %0 = vector.load %arg0[%c0, %c0_0] : memref<32x48xf32, #tpu.memory_space<vmem>>, vector<32x48xf32>
    %c0_1 = arith.constant 0 : index
    %c0_2 = arith.constant 0 : index
    %1 = vector.load %arg2[%c0_1, %c0_2] : memref<168x128xf32, #tpu.memory_space<vmem>>, vector<48x32xf32>
    %cst = arith.constant dense<0.000000e+00> : vector<32x32xf32>
    %2 = tpu.matmul %0, %1, %cst {dimension_numbers = #tpu.dot_dimension_numbers<[1], [0], [0], [1], [0, 0, 1, 1], [], []>} : vector<32x48xf32>, vector<48x32xf32>, vector<32x32xf32> -> vector<32x32xf32>
    %c160 = arith.constant 160 : index
    %c0_3 = arith.constant 0 : index
    %3 = vector.load %arg2[%c160, %c0_3] : memref<168x128xf32, #tpu.memory_space<vmem>>, vector<1x32xf32>
    %4 = vector.broadcast %3 : vector<1x32xf32> to vector<32x32xf32>
    %5 = arith.addf %2, %4 : vector<32x32xf32>
    %cst_4 = arith.constant 0.000000e+00 : f32
    %6 = vector.broadcast %cst_4 : f32 to vector<32x32xf32>
    %7 = arith.maximumf %5, %6 : vector<32x32xf32>
    %c152 = arith.constant 152 : index
    %c0_5 = arith.constant 0 : index
    %8 = vector.load %arg2[%c152, %c0_5] : memref<168x128xf32, #tpu.memory_space<vmem>>, vector<2x32xf32>
    %cst_6 = arith.constant dense<0.000000e+00> : vector<2x32xf32>
    %9 = tpu.matmul %8, %7, %cst_6 {dimension_numbers = #tpu.dot_dimension_numbers<[1], [0], [0], [1], [0, 0, 1, 1], [], []>} : vector<2x32xf32>, vector<32x32xf32>, vector<2x32xf32> -> vector<2x32xf32>
    %c136 = arith.constant 136 : index
    %c0_7 = arith.constant 0 : index
    %10 = vector.load %arg2[%c136, %c0_7] : memref<168x128xf32, #tpu.memory_space<vmem>>, vector<16x16xf32>
    %c0_8 = arith.constant 0 : index
    %c0_9 = arith.constant 0 : index
    %11 = vector.load %arg1[%c0_8, %c0_9] : memref<16x8xf32, #tpu.memory_space<vmem>>, vector<16x8xf32>
    %c48 = arith.constant 48 : index
    %c0_10 = arith.constant 0 : index
    %12 = vector.load %arg2[%c48, %c0_10] : memref<168x128xf32, #tpu.memory_space<vmem>>, vector<8x16xf32>
    %cst_11 = arith.constant dense<0.000000e+00> : vector<16x16xf32>
    %13 = tpu.matmul %11, %12, %cst_11 {dimension_numbers = #tpu.dot_dimension_numbers<[1], [0], [0], [1], [0, 0, 1, 1], [], []>} : vector<16x8xf32>, vector<8x16xf32>, vector<16x16xf32> -> vector<16x16xf32>
    %cst_12 = arith.constant dense<0.000000e+00> : vector<16x16xf32>
    %14 = tpu.matmul %10, %13, %cst_12 {dimension_numbers = #tpu.dot_dimension_numbers<[1], [0], [0], [1], [0, 0, 1, 1], [], []>} : vector<16x16xf32>, vector<16x16xf32>, vector<16x16xf32> -> vector<16x16xf32>
    %c161 = arith.constant 161 : index
    %c0_13 = arith.constant 0 : index
    %15 = vector.load %arg2[%c161, %c0_13] : memref<168x128xf32, #tpu.memory_space<vmem>>, vector<1x16xf32>
    %16 = vector.broadcast %15 : vector<1x16xf32> to vector<16x16xf32>
    %17 = arith.addf %14, %16 : vector<16x16xf32>
    %cst_14 = arith.constant 0.000000e+00 : f32
    %18 = vector.broadcast %cst_14 : f32 to vector<16x16xf32>
    %19 = arith.maximumf %17, %18 : vector<16x16xf32>
    %c56 = arith.constant 56 : index
    %c0_15 = arith.constant 0 : index
    %20 = vector.load %arg2[%c56, %c0_15] : memref<168x128xf32, #tpu.memory_space<vmem>>, vector<16x32xf32>
    %cst_16 = arith.constant dense<0.000000e+00> : vector<16x32xf32>
    %21 = tpu.matmul %19, %20, %cst_16 {dimension_numbers = #tpu.dot_dimension_numbers<[1], [0], [0], [1], [0, 0, 1, 1], [], []>} : vector<16x16xf32>, vector<16x32xf32>, vector<16x32xf32> -> vector<16x32xf32>
    %cst_17 = arith.constant dense<0.000000e+00> : vector<16x32xf32>
    %22 = tpu.matmul %10, %21, %cst_17 {dimension_numbers = #tpu.dot_dimension_numbers<[1], [0], [0], [1], [0, 0, 1, 1], [], []>} : vector<16x16xf32>, vector<16x32xf32>, vector<16x32xf32> -> vector<16x32xf32>
    %c162 = arith.constant 162 : index
    %c0_18 = arith.constant 0 : index
    %23 = vector.load %arg2[%c162, %c0_18] : memref<168x128xf32, #tpu.memory_space<vmem>>, vector<1x32xf32>
    %24 = vector.broadcast %23 : vector<1x32xf32> to vector<16x32xf32>
    %25 = arith.addf %22, %24 : vector<16x32xf32>
    %cst_19 = arith.constant 0.000000e+00 : f32
    %26 = vector.broadcast %cst_19 : f32 to vector<16x32xf32>
    %27 = arith.maximumf %25, %26 : vector<16x32xf32>
    %c152_20 = arith.constant 152 : index
    %c32 = arith.constant 32 : index
    %28 = vector.load %arg2[%c152_20, %c32] : memref<168x128xf32, #tpu.memory_space<vmem>>, vector<2x16xf32>
    %cst_21 = arith.constant dense<0.000000e+00> : vector<2x32xf32>
    %29 = tpu.matmul %28, %27, %cst_21 {dimension_numbers = #tpu.dot_dimension_numbers<[1], [0], [0], [1], [0, 0, 1, 1], [], []>} : vector<2x16xf32>, vector<16x32xf32>, vector<2x32xf32> -> vector<2x32xf32>
    %30 = tpu.concatenate %9, %29 in 0 : vector<2x32xf32>, vector<2x32xf32> -> vector<4x32xf32>
    %c72 = arith.constant 72 : index
    %c0_22 = arith.constant 0 : index
    %31 = vector.load %arg2[%c72, %c0_22] : memref<168x128xf32, #tpu.memory_space<vmem>>, vector<32x96xf32>
    %cst_23 = arith.constant dense<0.000000e+00> : vector<4x96xf32>
    %32 = tpu.matmul %30, %31, %cst_23 {dimension_numbers = #tpu.dot_dimension_numbers<[1], [0], [0], [1], [0, 0, 1, 1], [], []>} : vector<4x32xf32>, vector<32x96xf32>, vector<4x96xf32> -> vector<4x96xf32>
    %33 = vector.extract_strided_slice %32 {offsets = [0, 0], sizes = [2, 32], strides = [1, 1]} : vector<4x96xf32> to vector<2x32xf32>
    %34 = vector.extract_strided_slice %32 {offsets = [2, 0], sizes = [2, 32], strides = [1, 1]} : vector<4x96xf32> to vector<2x32xf32>
    %35 = vector.extract_strided_slice %32 {offsets = [0, 32], sizes = [2, 32], strides = [1, 1]} : vector<4x96xf32> to vector<2x32xf32>
    %36 = vector.extract_strided_slice %32 {offsets = [2, 32], sizes = [2, 32], strides = [1, 1]} : vector<4x96xf32> to vector<2x32xf32>
    %37 = vector.extract_strided_slice %32 {offsets = [0, 64], sizes = [2, 32], strides = [1, 1]} : vector<4x96xf32> to vector<2x32xf32>
    %38 = vector.extract_strided_slice %32 {offsets = [2, 64], sizes = [2, 32], strides = [1, 1]} : vector<4x96xf32> to vector<2x32xf32>
    %39 = arith.mulf %33, %35 : vector<2x32xf32>
    %cst_24 = arith.constant dense<0.000000e+00> : vector<2xf32>
    %40 = vector.multi_reduction <add>, %39, %cst_24 [1] : vector<2x32xf32> to vector<2xf32>
    %41 = vector.shape_cast %40 : vector<2xf32> to vector<2x1xf32>
    %42 = arith.mulf %33, %36 : vector<2x32xf32>
    %cst_25 = arith.constant dense<0.000000e+00> : vector<2xf32>
    %43 = vector.multi_reduction <add>, %42, %cst_25 [1] : vector<2x32xf32> to vector<2xf32>
    %44 = vector.shape_cast %43 : vector<2xf32> to vector<2x1xf32>
    %45 = arith.mulf %34, %35 : vector<2x32xf32>
    %cst_26 = arith.constant dense<0.000000e+00> : vector<2xf32>
    %46 = vector.multi_reduction <add>, %45, %cst_26 [1] : vector<2x32xf32> to vector<2xf32>
    %47 = vector.shape_cast %46 : vector<2xf32> to vector<2x1xf32>
    %48 = arith.mulf %34, %36 : vector<2x32xf32>
    %cst_27 = arith.constant dense<0.000000e+00> : vector<2xf32>
    %49 = vector.multi_reduction <add>, %48, %cst_27 [1] : vector<2x32xf32> to vector<2xf32>
    %50 = vector.shape_cast %49 : vector<2xf32> to vector<2x1xf32>
    %51 = arith.maximumf %41, %44 : vector<2x1xf32>
    %52 = arith.subf %41, %51 : vector<2x1xf32>
    %53 = math.exp %52 : vector<2x1xf32>
    %54 = arith.subf %44, %51 : vector<2x1xf32>
    %55 = math.exp %54 : vector<2x1xf32>
    %56 = vector.broadcast %53 : vector<2x1xf32> to vector<2x32xf32>
    %57 = arith.mulf %56, %37 : vector<2x32xf32>
    %58 = vector.broadcast %55 : vector<2x1xf32> to vector<2x32xf32>
    %59 = arith.mulf %58, %38 : vector<2x32xf32>
    %60 = arith.addf %57, %59 : vector<2x32xf32>
    %61 = arith.addf %53, %55 : vector<2x1xf32>
    %62 = tpu.reciprocal %61 {approx = true} : vector<2x1xf32> -> vector<2x1xf32>
    %63 = vector.broadcast %62 : vector<2x1xf32> to vector<2x32xf32>
    %64 = arith.mulf %60, %63 : vector<2x32xf32>
    %65 = arith.maximumf %47, %50 : vector<2x1xf32>
    %66 = arith.subf %47, %65 : vector<2x1xf32>
    %67 = math.exp %66 : vector<2x1xf32>
    %68 = arith.subf %50, %65 : vector<2x1xf32>
    %69 = math.exp %68 : vector<2x1xf32>
    %70 = vector.broadcast %67 : vector<2x1xf32> to vector<2x32xf32>
    %71 = arith.mulf %70, %37 : vector<2x32xf32>
    %72 = vector.broadcast %69 : vector<2x1xf32> to vector<2x32xf32>
    %73 = arith.mulf %72, %38 : vector<2x32xf32>
    %74 = arith.addf %71, %73 : vector<2x32xf32>
    %75 = arith.addf %67, %69 : vector<2x1xf32>
    %76 = tpu.reciprocal %75 {approx = true} : vector<2x1xf32> -> vector<2x1xf32>
    %77 = vector.broadcast %76 : vector<2x1xf32> to vector<2x32xf32>
    %78 = arith.mulf %74, %77 : vector<2x32xf32>
    %79 = arith.addf %64, %78 : vector<2x32xf32>
    %cst_28 = arith.constant 5.000000e-01 : f32
    %80 = vector.broadcast %cst_28 : f32 to vector<2x32xf32>
    %81 = arith.mulf %80, %79 : vector<2x32xf32>
    %c104 = arith.constant 104 : index
    %c0_29 = arith.constant 0 : index
    %82 = vector.load %arg2[%c104, %c0_29] : memref<168x128xf32, #tpu.memory_space<vmem>>, vector<32x128xf32>
    %cst_30 = arith.constant dense<0.000000e+00> : vector<2x128xf32>
    %83 = tpu.matmul %81, %82, %cst_30 {dimension_numbers = #tpu.dot_dimension_numbers<[1], [0], [0], [1], [0, 0, 1, 1], [], []>} : vector<2x32xf32>, vector<32x128xf32>, vector<2x128xf32> -> vector<2x128xf32>
    %c163 = arith.constant 163 : index
    %c0_31 = arith.constant 0 : index
    %84 = vector.load %arg2[%c163, %c0_31] : memref<168x128xf32, #tpu.memory_space<vmem>>, vector<1x128xf32>
    %85 = vector.broadcast %84 : vector<1x128xf32> to vector<2x128xf32>
    %86 = arith.addf %83, %85 : vector<2x128xf32>
    %cst_32 = arith.constant 0.000000e+00 : f32
    %87 = vector.broadcast %cst_32 : f32 to vector<2x96xf32>
    %88 = tpu.concatenate %9, %87 in 1 : vector<2x32xf32>, vector<2x96xf32> -> vector<2x128xf32>
    %89 = tpu.concatenate %81, %87 in 1 : vector<2x32xf32>, vector<2x96xf32> -> vector<2x128xf32>
    %cst_33 = arith.constant 0.000000e+00 : f32
    %90 = vector.broadcast %cst_33 : f32 to vector<2x128xf32>
    %91 = tpu.concatenate %88, %89, %86, %90 in 0 : vector<2x128xf32>, vector<2x128xf32>, vector<2x128xf32>, vector<2x128xf32> -> vector<8x128xf32>
    %c0_34 = arith.constant 0 : index
    %c0_35 = arith.constant 0 : index
    %92 = vector.load %arg3[%c0_34, %c0_35] : memref<8x128xf32, #tpu.memory_space<vmem>>, vector<8x128xf32>
    tpu.vector_store %arg3[%c0_34, %c0_35], %91 {strides = array<i32>} : memref<8x128xf32, #tpu.memory_space<vmem>>, vector<8x128xf32>,
    return
  }
}

</mosaic_0001>

<bundles_post_ra>
// kernel: forward.1
= control target key start
LH: loop header
LB: loop body
LE: loop exit
PB: predicated region body
PF: predicated region fallthrough
CT: control target
= control target key end

     0   :  { %vm29_vm0 = vcmask 392192   ;;  %v1045_v10 = vmov 0.0   ;;  %vm1046_vm1 = vmmov 0   ;;  %vm132_vm2 = vcmask 261120   ;;  %s1047_s23 = smov 96   ;;  %s1226_s2 = inlined_call_operand.vmem [shape: f32[168,128], index: 2, kind: input, shape index: {}]   ;;  %s1227_s0 = inlined_call_operand.vmem [shape: f32[32,48], index: 0, kind: input, shape index: {}]   ;;  %s1228_s1 = inlined_call_operand.vmem [shape: f32[16,8], index: 1, kind: input, shape index: {}]   ;;  %s1229_s3 = inlined_call_operand.vmem [shape: f32[8,128], index: 3, kind: output, shape index: {}]  }
   0x1   :  { %v23_v0 = vld [vmem:[%s1226_s2 + $0x28] sm:$0xff]  ;;  %v22_v1 = vld [vmem:[%s1226_s2 + $0x20] sm:$0xff]  ;;  %v21_v2 = vld [vmem:[%s1226_s2 + $0x18] sm:$0xff]  ;;  %963 = vmatprep.subr.mxu1 %v1045_v10  ;;  %971 = vmatprep.mubr.msk.f32.mxu1 %vm1046_vm1, %v1045_v10  ;;  %vm211_vm3 = vcmask 64512   ;;  %vm298_vm4 = vcmask 130048   ;;  %vm624_vm5 = vcmask 1041408  }
   0x2   :  { %945 = vmatprep.subr.mxu0 %v23_v0  ;;  %v14_v3 = vld [vmem:[%s1227_s0] sm:$0xff]  ;;  %v20_v4 = vld [vmem:[%s1226_s2 + $0x10] sm:$0xff]  ;;  %v19_v5 = vld [vmem:[%s1226_s2 + $0x8] sm:$0xff]  ;;  %vm725_vm6 = vcmask 257026   ;;  %vm708_vm7 = vcmask 254976   ;;  %vm873_vm8 = vcmask 1043456  }
   0x3   :  { %946 = vmatpush3.msra.mxu0 %v23_v0  ;;  %957 = vmatprep.mubr.msk.f32.mxu0 %vm29_vm0, %v14_v3  ;;  %v18_v6 = vld [vmem:[%s1226_s2] sm:$0xff]  ;;  %v15_v7 = vld [vmem:[%s1227_s0 + $0x8] sm:$0xff]  ;;  %v16_v8 = vld [vmem:[%s1227_s0 + $0x10] sm:$0xff]  ;;  %vm875_vm9 = vcmask 1045504  }
   0x4   :  { %947 = vmatprep.subr.mxu0 %v22_v1  ;;  %v17_v9 = vld [vmem:[%s1227_s0 + $0x18] sm:$0xff]  ;;  %v882_v13 = vld [vmem:[%s1226_s2 + $0xa0] ss:$0 sm:$0xff]  ;;  %v210_v25 = vld [vmem:[%s1226_s2 + $0x30] sm:$0xff]  ;;  %s1048_s0 = smov 64  }
   0x5   :  { %948 = vmatpush3.msra.mxu0 %v22_v1  ;;  %v131_v24 = vld [vmem:[%s1226_s2 + $0x98] sm:$0x3]  ;;  %v208_v26 = vld [vmem:[%s1228_s1] sm:$0xff]  ;;  %v209_v27 = vld [vmem:[%s1228_s1 + $0x8] sm:$0xff] }
   0x6   :  { %949 = vmatprep.subr.mxu0 %v21_v2  ;;  %v206_v28 = vld [vmem:[%s1226_s2 + $0x88] sm:$0xff]  ;;  %v207_v33 = vld [vmem:[%s1226_s2 + $0x90] sm:$0xff]  ;;  %v383_v34 = vld [vmem:[%s1226_s2 + $0x40] sm:$0xff]  ;;  %547 = vrot.lane.b32.xlu0 %v131_v24, %s1047_s23 }
   0x7   :  { %950 = vmatpush3.msra.mxu0 %v21_v2  ;;  %v382_v35 = vld [vmem:[%s1226_s2 + $0x38] sm:$0xff]  ;;  %v890_v36 = vld [vmem:[%s1226_s2 + $0xa1] ss:$0 sm:$0xff]  ;;  %v895_v47 = vld [vmem:[%s1226_s2 + $0xa2] ss:$0 sm:$0xff] }
   0x8   :  { %951 = vmatprep.subr.mxu0 %v20_v4  ;;  %v629_v45 = vld [vmem:[%s1226_s2 + $0x60] sm:$0xff]  ;;  %v628_v46 = vld [vmem:[%s1226_s2 + $0x58] sm:$0xff]  ;;  %v627_v55 = vld [vmem:[%s1226_s2 + $0x50] sm:$0xff] }
   0x9   :  { %952 = vmatpush3.msra.mxu0 %v20_v4  ;;  %v626_v56 = vld [vmem:[%s1226_s2 + $0x48] sm:$0xff] }
   0xa   :  { %953 = vmatprep.subr.mxu0 %v19_v5 }
   0xb   :  { %954 = vmatpush3.msra.mxu0 %v19_v5 }
   0xc   :  { %955 = vmatprep.subr.mxu0 %v18_v6 }
   0xd   :  { %956 = vmatpush3.msra.mxu0 %v18_v6 }
   0xe   :  { %958 = vmatmul.mubr.msk.f32.vlgmr.msra.gmra.mxu0 %vm29_vm0, %v15_v7  ;;  %986 = vmatprep.subr.mxu0 %v383_v34 }
   0xf   :  { %960 = vmatprep.mubr.msk.f32.mxu0 %vm29_vm0, %v16_v8  ;;  %987 = vmatpush3.msra.mxu0 %v383_v34 }
  0x10   :  { %988 = vmatprep.subr.mxu0 %v382_v35 }
  0x11   :  { %989 = vmatpush3.msra.mxu0 %v382_v35 }
  0x12   :  { %961 = vmatmul.mubr.msk.f32.gmra.mxu0 %vm29_vm0, %v17_v9  ;;  %1000 = vmatprep.subr.mxu0 %v1045_v10 }
  0x78   :  { %v548_v54 = vpop.permute.xlu0 %547 }
  0xce   :  { %v959_v11 = vpop.f32.mrf.mxu0 }
  0xcf   :  { %v114_v17 = vadd.f32 %v959_v11, %v882_v13 }
  0xd0   :  { %v108_v12 = vpop.f32.mrf.mxu0 }
  0xd1   :  { %v109_v20 = vadd.f32 %v882_v13, %v108_v12  ;;  %v128_v22 = vmax.f32 %v114_v17, 0.0 }
  0xd2   :  { %v962_v14 = vpop.f32.mrf.mxu0 }
  0xd3   :  { %v124_v15 = vadd.f32 %v962_v14, %v882_v13  ;;  %v127_v23 = vmax.f32 %v109_v20, 0.0 }
  0xd4   :  { %v118_v16 = vpop.f32.mrf.mxu0 }
  0xd5   :  { %v130_v18 = vmax.f32 %v124_v15, 0.0  ;;  %v119_v19 = vadd.f32 %v882_v13, %v118_v16 }
  0xd7   :  { %v129_v21 = vmax.f32 %v119_v19, 0.0  ;;  %964 = vmatpush3.msra.mxu1 %v130_v18 }
  0xd8   :  { %965 = vmatprep.subr.mxu1 %v1045_v10 }
  0xd9   :  { %966 = vmatpush3.msra.mxu1 %v129_v21 }
  0xda   :  { %967 = vmatprep.subr.mxu1 %v1045_v10 }
  0xdb   :  { %968 = vmatpush3.msra.mxu1 %v128_v22 }
  0xdc   :  { %969 = vmatprep.subr.mxu1 %v1045_v10 }
  0xdd   :  { %970 = vmatpush3.msra.mxu1 %v127_v23 }
  0xde   :  { %972 = vmatmul.mubr.msk.f32.vlgmr.msra.gmra.mxu1 %vm132_vm2, %v131_v24  ;;  %974 = vmatprep.subr.mxu1 %v210_v25 }
  0xdf   :  { %975 = vmatpush3.msra.mxu1 %v210_v25  ;;  %976 = vmatprep.mubr.msk.f32.mxu1 %vm211_vm3, %v208_v26 }
  0xe2   :  { %977 = vmatmul.mubr.msk.f32.vlgmr.msra.gmra.mxu1 %vm211_vm3, %v209_v27 }
  0xe3   :  { %983 = vmatprep.mubr.msk.f32.mxu1 %vm298_vm4, %v206_v28 }
 0x19e   :  { %v1129_v29 = vpop.f32.mrf.mxu1 }
 0x1a0   :  { %v973_v30 = vpop.f32.mrf.mxu1 }
 0x1a2   :  { %v978_v31 = vpop.f32.mrf.mxu1 }
 0x1a3   :  { %979 = vmatprep.subr.mxu1 %v978_v31 }
 0x1a4   :  { %v284_v32 = vpop.f32.mrf.mxu1  ;;  %980 = vmatpush3.msra.mxu1 %v978_v31 }
 0x1a5   :  { %981 = vmatprep.subr.mxu1 %v284_v32 }
 0x1a6   :  { %982 = vmatpush3.msra.mxu1 %v284_v32 }
 0x1a7   :  { %984 = vmatmul.mubr.msk.f32.vlgmr.msra.gmra.mxu1 %vm298_vm4, %v207_v33 }
 0x1a8   :  { %997 = vmatprep.mubr.msk.f32.mxu1 %vm298_vm4, %v206_v28 }
 0x267   :  { %v985_v37 = vpop.f32.mrf.mxu1 }
 0x268   :  { %v377_v38 = vadd.f32 %v985_v37, %v890_v36  ;;  %v782_v37 = vld [vmem:[%s1226_s2 + $0x80] sm:$0xff] }
 0x269   :  { %v371_v39 = vpop.f32.mrf.mxu1 }
 0x26a   :  { %v372_v40 = vadd.f32 %v890_v36, %v371_v39  ;;  %v381_v42 = vmax.f32 %v377_v38, 0.0  ;;  %v781_v38 = vld [vmem:[%s1226_s2 + $0x78] sm:$0xff] }
 0x26c   :  { %v380_v41 = vmax.f32 %v372_v40, 0.0 }
 0x26e   :  { %990 = vmatprep.mubr.msk.f32.mxu0 %vm298_vm4, %v380_v41  ;;  %v780_v41 = vld [vmem:[%s1226_s2 + $0x70] sm:$0xff] }
 0x26f   :  { %991 = vmatmul.mubr.msk.f32.vlgmr.msra.gmra.mxu0 %vm298_vm4, %v381_v42 }
 0x270   :  { %1004 = vmatprep.mubr.msk.f32.mxu0 %vm1046_vm1, %v1045_v10 }
 0x32f   :  { %v992_v43 = vpop.f32.mrf.mxu0 }
 0x330   :  { %993 = vmatprep.subr.mxu1 %v992_v43 }
 0x331   :  { %v456_v44 = vpop.f32.mrf.mxu0  ;;  %994 = vmatpush3.msra.mxu1 %v992_v43 }
 0x332   :  { %995 = vmatprep.subr.mxu1 %v456_v44 }
 0x333   :  { %996 = vmatpush3.msra.mxu1 %v456_v44  ;;  %v779_v44 = vld [vmem:[%s1226_s2 + $0x68] sm:$0xff] }
 0x334   :  { %998 = vmatmul.mubr.msk.f32.vlgmr.msra.gmra.mxu1 %vm298_vm4, %v207_v33  ;;  %1007 = vmatprep.subr.mxu1 %v1045_v10 }
 0x335   :  { %1015 = vmatprep.mubr.msk.f32.mxu1 %vm1046_vm1, %v1045_v10  ;;  %1008 = vmatpush3.msra.mxu1 %v629_v45 }
 0x336   :  { %1009 = vmatprep.subr.mxu1 %v1045_v10 }
 0x337   :  { %1010 = vmatpush3.msra.mxu1 %v628_v46 }
 0x338   :  { %1011 = vmatprep.subr.mxu1 %v1045_v10 }
 0x339   :  { %1012 = vmatpush3.msra.mxu1 %v627_v55 }
 0x33a   :  { %1013 = vmatprep.subr.mxu1 %v1045_v10 }
 0x33b   :  { %1014 = vmatpush3.msra.mxu1 %v626_v56  ;;  %v900_v56 = vld [vmem:[%s1226_s2 + $0xa3] ss:$0 sm:$0xff] }
 0x3f4   :  { %v999_v48 = vpop.f32.mrf.mxu1 }
 0x3f5   :  { %v542_v49 = vadd.f32 %v999_v48, %v895_v47 }
 0x3f6   :  { %v536_v50 = vpop.f32.mrf.mxu1 }
 0x3f7   :  { %v546_v51 = vmax.f32 %v542_v49, 0.0  ;;  %v537_v52 = vadd.f32 %v895_v47, %v536_v50 }
 0x3f9   :  { %v545_v53 = vmax.f32 %v537_v52, 0.0  ;;  %1001 = vmatpush3.msra.mxu0 %v546_v51 }
 0x3fa   :  { %1002 = vmatprep.subr.mxu0 %v1045_v10 }
 0x3fb   :  { %1003 = vmatpush3.msra.mxu0 %v545_v53 }
 0x3fc   :  { %1005 = vmatmul.mubr.msk.f32.vlgmr.msra.gmra.mxu0 %vm298_vm4, %v548_v54  ;;  %1018 = vmatprep.subr.mxu0 %v1045_v10 }
 0x3fd   :  { %1026 = vmatprep.mubr.msk.f32.mxu0 %vm1046_vm1, %v1045_v10  ;;  %1019 = vmatpush3.msra.mxu0 %v782_v37 }
 0x3fe   :  { %1020 = vmatprep.subr.mxu0 %v1045_v10 }
 0x3ff   :  { %1021 = vmatpush3.msra.mxu0 %v781_v38 }
 0x400   :  { %1022 = vmatprep.subr.mxu0 %v1045_v10 }
 0x401   :  { %1023 = vmatpush3.msra.mxu0 %v780_v41 }
 0x402   :  { %1024 = vmatprep.subr.mxu0 %v1045_v10 }
 0x403   :  { %1025 = vmatpush3.msra.mxu0 %v779_v44 }
 0x4bc   :  { %v617_v57 = vpop.f32.mrf.mxu0 }
 0x4bd   :  { %v622_v58 = vrot.slane %v617_v57, 6 }
 0x4be   :  { %v1006_v59 = vpop.f32.mrf.mxu0 }
 0x4bf   :  { %v625_v60 = vsel %vm624_vm5, %v1129_v29, %v622_v58 }
 0x4c0   :  { %1016 = vmatmul.mubr.msk.f32.vlgmr.msra.gmra.mxu1 %vm132_vm2, %v625_v60 }
 0x580   :  { %v1181_v61 = vpop.f32.mrf.mxu1 }
 0x581   :  { %704 = vrot.lane.b32.xlu0 %v1181_v61, %s1047_s23  ;;  %v720_v62 = vrot.slane %v1181_v61, 6  ;;  %v712_v0 = vrot.slane %v1181_v61, 2 }
 0x582   :  { %v1017_v63 = vpop.f32.mrf.mxu1 }
 0x583   :  { %721 = vrot.lane.b32.xlu1 %v720_v62, %s1047_s23 }
 0x587   :  { %713 = vrot.lane.b32.xlu1 %v712_v0, %s1047_s23 }
 0x5f3   :  { %v705_v1 = vpop.permute.xlu0 %704 }
 0x5f4   :  { %v707_v2 = vmul.f32 %v705_v1, %v1181_v61 }
 0x5f5   :  { %v722_v3 = vpop.permute.xlu1 %721 }
 0x5f6   :  { %v724_v4 = vmul.f32 %v722_v3, %v1181_v61  ;;  %v729_v5 = vsel %vm725_vm6, %v707_v2, 0.0  ;;  %v709_v9 = vsel %vm708_vm7, %v707_v2, 0.0 }
 0x5f7   :  { %730 = vadd.xlane.f32.xlu1 %v729_v5 }
 0x5f8   :  { %v726_v6 = vsel %vm725_vm6, %v724_v4, 0.0 }
 0x5f9   :  { %727 = vadd.xlane.f32.xlu0 %v726_v6  ;;  %v714_v7 = vpop.permute.xlu1 %713 }
 0x5fa   :  { %v716_v8 = vmul.f32 %v714_v7, %v1181_v61 }
 0x5fc   :  { %v717_v11 = vsel %vm708_vm7, %v716_v8, 0.0 }
 0x5fd   :  { %710 = vadd.xlane.f32.xlu0 %v709_v9 }
 0x601   :  { %718 = vadd.xlane.f32.xlu0 %v717_v11 }
 0x608   :  { %759 = vrot.lane.b32.xlu1 %v720_v62, %s1048_s0 }
 0x617   :  { %740 = vrot.lane.b32.xlu0 %v712_v0, %s1048_s0 }
 0x680   :  { %v731_v12 = vpop.xlane.xlu1 %730 }
 0x682   :  { %v728_v13 = vpop.xlane.xlu0 %727 }
 0x683   :  { %v752_v14 = vmax.f32 %v728_v13, %v731_v12 }
 0x684   :  { %v760_v36 = vpop.permute.xlu1 %759 }
 0x685   :  { %v753_v15 = vsub.f32 %v728_v13, %v752_v14  ;;  %v756_v16 = vsub.f32 %v731_v12, %v752_v14 }
 0x686   :  { %v711_v17 = vpop.xlane.xlu0 %710 }
 0x687   :  { %v754_v18 = vmul.f32 1.442695, %v753_v15  ;;  %v757_v19 = vmul.f32 1.442695, %v756_v16 }
 0x689   :  { %1033 = vpow2.f32 %v754_v18 }
 0x68a   :  { %1035 = vpow2.f32 %v757_v19  ;;  %v719_v20 = vpop.xlane.xlu0 %718 }
 0x68b   :  { %v732_v21 = vmax.f32 %v711_v17, %v719_v20 }
 0x68d   :  { %v733_v22 = vsub.f32 %v711_v17, %v732_v21  ;;  %v736_v23 = vsub.f32 %v719_v20, %v732_v21 }
 0x68e   :  { %v741_v33 = vpop.permute.xlu0 %740 }
 0x68f   :  { %v734_v24 = vmul.f32 1.442695, %v733_v22  ;;  %v737_v25 = vmul.f32 1.442695, %v736_v23 }
 0x691   :  { %1037 = vpow2.f32 %v734_v24 }
 0x692   :  { %1039 = vpow2.f32 %v737_v25 }
 0x696   :  { %v1034_v26 = vpop.eup %1033 }
 0x697   :  { %v1036_v27 = vpop.eup %1035  ;;  %v762_v39 = vmul.f32 %v1034_v26, %v760_v36 }
 0x698   :  { %v769_v28 = vadd.f32 %v1036_v27, %v1034_v26  ;;  %v763_v30 = vmul.f32 %v1036_v27, %v1181_v61 }
 0x69a   :  { %765 = vrot.lane.b32.xlu1 %v763_v30, %s1048_s0  ;;  %1041 = vrcp.f32 %v769_v28 }
 0x69e   :  { %v1038_v31 = vpop.eup %1037 }
 0x69f   :  { %v1040_v32 = vpop.eup %1039  ;;  %v739_v47 = vmul.f32 %v1038_v31, %v1181_v61  ;;  %v863_v61 = vsel %vm132_vm2, %v1129_v29, 0.0 }
 0x6a0   :  { %v749_v34 = vadd.f32 %v1040_v32, %v1038_v31  ;;  %v743_v35 = vmul.f32 %v1040_v32, %v741_v33 }
 0x6a2   :  { %745 = vrot.lane.b32.xlu1 %v743_v35, %s1048_s0  ;;  %1043 = vrcp.f32 %v749_v34 }
 0x6a7   :  { %v1042_v43 = vpop.eup %1041 }
 0x6af   :  { %v1044_v50 = vpop.eup %1043 }
 0x70c   :  { %v766_v40 = vpop.permute.xlu1 %765 }
 0x70d   :  { %v768_v42 = vadd.f32 %v766_v40, %v762_v39 }
 0x70f   :  { %v771_v45 = vmul.f32 %v1042_v43, %v768_v42 }
 0x711   :  { %v773_v46 = vrot.slane %v771_v45, 2 }
 0x713   :  { %774 = vrot.lane.b32.xlu0 %v773_v46, %s1048_s0 }
 0x714   :  { %v746_v48 = vpop.permute.xlu1 %745 }
 0x715   :  { %v748_v49 = vadd.f32 %v746_v48, %v739_v47 }
 0x717   :  { %v751_v51 = vmul.f32 %v1044_v50, %v748_v49 }
 0x785   :  { %v775_v52 = vpop.permute.xlu0 %774 }
 0x786   :  { %v777_v53 = vadd.f32 %v775_v52, %v751_v51 }
 0x788   :  { %v778_v54 = vmul.f32 0.5, %v777_v53 }
 0x78a   :  { %789 = vrot.lane.b32.xlu1 %v778_v54, %s1048_s0 }
 0x7fc   :  { %v790_v55 = vpop.permute.xlu1 %789 }
 0x7fd   :  { %1027 = vmatmul.mubr.msk.f32.vlgmr.msra.gmra.mxu0 %vm132_vm2, %v790_v55  ;;  %v865_v10 = vsel %vm132_vm2, %v790_v55, 0.0 }
 0x7fe   :  { %v867_v57 = vrot.slane %v865_v10, 6 }
 0x800   :  { %v872_v63 = vsel %vm624_vm5, %v863_v61, %v867_v57 }
 0x8bd   :  { %v859_v58 = vpop.f32.mrf.mxu0 }
 0x8be   :  { %v860_v59 = vadd.f32 %v900_v56, %v859_v58 }
 0x8bf   :  { %v1028_v60 = vpop.f32.mrf.mxu0 }
 0x8c0   :  { %v870_v62 = vrot.slane %v860_v59, 4 }
 0x8c2   :  { %v874_v0 = vsel %vm873_vm8, %v872_v63, %v870_v62 }
 0x8c3   :  { %v876_v1 = vsel %vm875_vm9, %v874_v0, 0.0 }
 0x8c4   :  { %877 = vst [vmem:[%s1229_s3] sm:$0xff] %v876_v1 }

</bundles_post_ra>
